<compile_context>
chip_gen: v7x
topology: tpu7x:2x2x1
jax: 0.10.0
libtpu: 0.0.40
codegen_flags: <defaults>
</compile_context>

<pallas_src>
import jax
import jax.numpy as jnp
from jax.experimental import pallas as pl
from jax.experimental.pallas import tpu as pltpu


MIN_STEPS = 8  # target pipelined grid steps (>= 4 per TensorCore on v7x)


# ----------------------------------------------------------------------------
# Kernels
# ----------------------------------------------------------------------------

def _fused_kernel(x_ref, w1_ref, w2_ref, o_ref):
    """Pool + SE-MLP + rescale for one batch tile.

    x_ref, o_ref: (Nt, C, HWp)   lane-dense spatial slab (HWp % 128 == 0)
    w1_ref:       (C, Cr)        conv1 weight, transposed, pre-scaled by 1/HW
    w2_ref:       (Cr, C)        conv2 weight, transposed
    """
    # Global average pool: 1/HW is folded into w1, so a lane-axis f32 sum of
    # the native-dtype block is all that's needed (no f32 slab copy).
    pooled = jnp.sum(x_ref[...], axis=-1, dtype=jnp.float32)               # (Nt, C)
    s = jnp.maximum(
        jnp.dot(pooled, w1_ref[...], preferred_element_type=jnp.float32), 0.0)
    z = jnp.dot(s, w2_ref[...], preferred_element_type=jnp.float32)        # (Nt, C)
    scale = jax.nn.sigmoid(z)
    # Channel-wise rescale in the native dtype, broadcast over the lane axis.
    o_ref[...] = x_ref[...] * scale.astype(o_ref.dtype)[:, :, None]


def _pool_mlp_kernel(x_ref, w1_ref, w2_ref, scale_ref, acc_ref):
    """Pass 1 (two-pass path): spatially-tiled pool + SE MLP.

    x_ref:     (N, C, hw_tile)   one spatial tile of the whole batch
    scale_ref: (N, C) f32        output scales (written on the last step)
    acc_ref:   (N, C) f32        VMEM accumulator, resident across the grid
    """
    @pl.when(pl.program_id(0) == 0)
    def _():
        acc_ref[...] = jnp.zeros_like(acc_ref)

    acc_ref[...] += jnp.sum(x_ref[...], axis=-1, dtype=jnp.float32)

    @pl.when(pl.program_id(0) == pl.num_programs(0) - 1)
    def _():
        s = jnp.maximum(
            jnp.dot(acc_ref[...], w1_ref[...],
                    preferred_element_type=jnp.float32), 0.0)
        z = jnp.dot(s, w2_ref[...], preferred_element_type=jnp.float32)
        scale_ref[...] = jax.nn.sigmoid(z).astype(scale_ref.dtype)


def _rescale_kernel(scale_ref, x_ref, o_ref):
    """Pass 2 (two-pass path): channel-wise rescale of one spatial tile."""
    o_ref[...] = x_ref[...] * scale_ref[...].astype(o_ref.dtype)[:, :, None]


# ----------------------------------------------------------------------------
# Tiling / budget helpers
# ----------------------------------------------------------------------------

def _tpu_budgets():
    """Generation-aware (x-block byte cap, scoped vmem_limit_bytes)."""
    try:
        vmem_cap = int(pltpu.get_tpu_info().vmem_capacity_bytes)
    except Exception:
        vmem_cap = 128 * 1024 * 1024
    if vmem_cap <= 64 * 1024 * 1024:
        # v7x: 64 MiB VMEM per TensorCore -> smaller blocks, conservative limit.
        return 2 * 1024 * 1024, 32 * 1024 * 1024
    # v5e / v6e: 128 MiB VMEM -> larger blocks are fine.
    return 4 * 1024 * 1024, 48 * 1024 * 1024


def _choose_n_tile(n, c, hw_p, itemsize, block_cap_bytes, min_steps):
    """Largest batch tile giving >= min_steps grid steps under the block cap."""
    bytes_per_image = c * hw_p * itemsize
    cap = max(1, block_cap_bytes // max(1, bytes_per_image))
    target = max(1, n // min_steps)
    limit = max(1, min(cap, target, n))
    for t in range(limit, 0, -1):
        if n % t == 0:
            return t
    return 1


def _choose_hw_tile(n_block, c, hw_p, itemsize, block_cap_bytes, min_steps):
    """Spatial tile (multiple of 128, divides hw_p) under the block cap."""
    bytes_per_unit = n_block * c * 128 * itemsize      # per 128 spatial lanes
    cap_units = max(1, block_cap_bytes // max(1, bytes_per_unit))
    total_units = hw_p // 128
    target_units = max(1, total_units // min_steps)
    limit = max(1, min(cap_units, target_units, total_units))
    for t in range(limit, 0, -1):
        if total_units % t == 0:
            return t * 128
    return 128


# ----------------------------------------------------------------------------
# pallas_call wrappers
# ----------------------------------------------------------------------------

def _fused_call(xr, w1_eff, w2_eff, n_tile, vmem_limit):
    N, C, HWp = xr.shape
    Cr = w1_eff.shape[1]
    itemsize = xr.dtype.itemsize
    cost = pl.CostEstimate(
        flops=2 * N * C * HWp + 4 * N * C * Cr,
        transcendentals=N * C,
        bytes_accessed=2 * N * C * HWp * itemsize + 2 * C * Cr * 4,
    )
    return pl.pallas_call(
        _fused_kernel,
        out_shape=jax.ShapeDtypeStruct((N, C, HWp), xr.dtype),
        grid_spec=pltpu.PrefetchScalarGridSpec(
            num_scalar_prefetch=0,
            grid=(N // n_tile,),
            in_specs=[
                pl.BlockSpec((n_tile, C, HWp), lambda i: (i, 0, 0)),
                pl.BlockSpec((C, Cr), lambda i: (0, 0)),     # resident weight
                pl.BlockSpec((Cr, C), lambda i: (0, 0)),     # resident weight
            ],
            out_specs=pl.BlockSpec((n_tile, C, HWp), lambda i: (i, 0, 0)),
        ),
        compiler_params=pltpu.CompilerParams(
            dimension_semantics=("parallel",),
            vmem_limit_bytes=vmem_limit,
        ),
        cost_estimate=cost,
    )(xr, w1_eff, w2_eff)


def _pool_mlp_call(xr, w1_eff, w2_eff, hw_tile, vmem_limit):
    N, C, HWp = xr.shape
    Cr = w1_eff.shape[1]
    itemsize = xr.dtype.itemsize
    cost = pl.CostEstimate(
        flops=2 * N * C * HWp + 4 * N * C * Cr,
        transcendentals=N * C,
        bytes_accessed=N * C * HWp * itemsize + N * C * 4 + 2 * C * Cr * 4,
    )
    return pl.pallas_call(
        _pool_mlp_kernel,
        out_shape=jax.ShapeDtypeStruct((N, C), jnp.float32),
        grid_spec=pltpu.PrefetchScalarGridSpec(
            num_scalar_prefetch=0,
            grid=(HWp // hw_tile,),
            in_specs=[
                pl.BlockSpec((N, C, hw_tile), lambda j: (0, 0, j)),
                pl.BlockSpec((C, Cr), lambda j: (0, 0)),
                pl.BlockSpec((Cr, C), lambda j: (0, 0)),
            ],
            out_specs=pl.BlockSpec((N, C), lambda j: (0, 0)),   # resident accumulator-style output
            scratch_shapes=[pltpu.VMEM((N, C), jnp.float32)],
        ),
        compiler_params=pltpu.CompilerParams(
            dimension_semantics=("arbitrary",),                 # spatial reduction axis
            vmem_limit_bytes=vmem_limit,
        ),
        cost_estimate=cost,
    )(xr, w1_eff, w2_eff)


def _rescale_call(xr, scales, hw_tile, vmem_limit):
    N, C, HWp = xr.shape
    itemsize = xr.dtype.itemsize
    cost = pl.CostEstimate(
        flops=N * C * HWp,
        transcendentals=0,
        bytes_accessed=2 * N * C * HWp * itemsize + N * C * 4,
    )
    return pl.pallas_call(
        _rescale_kernel,
        out_shape=jax.ShapeDtypeStruct((N, C, HWp), xr.dtype),
        grid_spec=pltpu.PrefetchScalarGridSpec(
            num_scalar_prefetch=0,
            grid=(HWp // hw_tile,),
            in_specs=[
                pl.BlockSpec((N, C), lambda j: (0, 0)),         # resident scales
                pl.BlockSpec((N, C, hw_tile), lambda j: (0, 0, j)),
            ],
            out_specs=pl.BlockSpec((N, C, hw_tile), lambda j: (0, 0, j)),
        ),
        compiler_params=pltpu.CompilerParams(
            dimension_semantics=("parallel",),
            vmem_limit_bytes=vmem_limit,
        ),
        cost_estimate=cost,
    )(scales, xr)


# ----------------------------------------------------------------------------
# Public wrapper
# ----------------------------------------------------------------------------

def channel_attention_layer(x, w1, w2):
    """x: (N, C, H, W); w1: (C//r, C) conv1 weight; w2: (C, C//r) conv2 weight."""
    N, C, H, W = x.shape
    HW = H * W
    HWp = -(-HW // 128) * 128                   # pad spatial to lane-dense width

    xr = x.reshape(N, C, HW)
    if HWp != HW:
        # Zero padding: does not perturb the pooled sum (1/HW uses the true HW)
        # and the padded output columns are sliced off below.
        xr = jnp.pad(xr, ((0, 0), (0, 0), (0, HWp - HW)))

    # Host-side weight prep: transpose so in-kernel matmuls are row-batched
    # (N,C)@(C,Cr) and (N,Cr)@(Cr,C); fold the 1/HW pooling scale into w1.
    w1_eff = (w1.astype(jnp.float32) / float(HW)).T            # (C, Cr)
    w2_eff = w2.astype(jnp.float32).T                          # (Cr, C)

    itemsize = xr.dtype.itemsize
    block_cap, vmem_limit = _tpu_budgets()
    bytes_per_image = C * HWp * itemsize

    if N >= MIN_STEPS and bytes_per_image <= block_cap:
        # Fused single-pass: batch-tiled, >= MIN_STEPS pipelined grid steps.
        n_tile = _choose_n_tile(N, C, HWp, itemsize, block_cap, MIN_STEPS)
        out = _fused_call(xr, w1_eff, w2_eff, n_tile, vmem_limit)
    else:
        # Small batch and/or very large H*W: two-pass, spatially tiled, so the
        # pipeline stays busy even at N = 1 and huge images never need a full
        # (C, H*W) slab in VMEM.  (Extremely large N combined with huge images
        # would want an additional batch tiling here; not needed at SE sizes.)
        hw_tile = _choose_hw_tile(N, C, HWp, itemsize, block_cap, MIN_STEPS)
        scales = _pool_mlp_call(xr, w1_eff, w2_eff, hw_tile, vmem_limit)
        out = _rescale_call(xr, scales, hw_tile, vmem_limit)

    if HWp != HW:
        out = out[:, :, :HW]
    return out.reshape(N, C, H, W)


def _reference(x, w1, w2):
    y = jnp.mean(x, axis=(2, 3), keepdims=True)                # (N, C, 1, 1)
    s = jnp.einsum('rc,nchw->nrhw', w1, y)                     # (N, Cr, 1, 1)
    s = jnp.maximum(s, 0.0)
    z = jnp.einsum('cr,nrhw->nchw', w2, s)                     # (N, C, 1, 1)
    return x * jax.nn.sigmoid(z)


if __name__ == "__main__":
    key = jax.random.PRNGKey(0)

    def run_case(n, c, h, w, reduction, case_key):
        cr = max(1, c // reduction)
        kx, k1, k2 = jax.random.split(case_key, 3)
        x = jax.random.normal(kx, (n, c, h, w), dtype=jnp.float32)
        w1 = jax.random.normal(k1, (cr, c), dtype=jnp.float32) * 0.1   # conv1 (out, in)
        w2 = jax.random.normal(k2, (c, cr), dtype=jnp.float32) * 0.1   # conv2 (out, in)
        out = jax.block_until_ready(channel_attention_layer(x, w1, w2))
        ref = _reference(x, w1, w2)
        assert out.shape == x.shape
        assert jnp.allclose(out, ref, atol=1e-5, rtol=1e-5), f"mismatch for {(n, c, h, w)}"

    ks = jax.random.split(key, 3)
    # channels=32, reduction=16 -> hidden = 2, bias=False (module defaults).
    run_case(2, 32, 16, 16, 16, ks[0])    # small N  -> two-pass (pool+MLP, rescale)
    run_case(16, 32, 16, 16, 16, ks[1])   # N >= 8   -> fused path, batch-tiled (8 steps)
    run_case(3, 32, 7, 7, 16, ks[2])      # 7x7 maps -> spatial axis padded to lane-dense 128

    print("KERNEL_OK")
</pallas_src>

<mosaic_0001>
module attributes {stable_mosaic.version = 11 : i64} {
  func.func @_pool_mlp_kernel(%arg0: i32, %arg1: memref<2x32x128xf32, #tpu.memory_space<vmem>>, %arg2: memref<32x2xf32, #tpu.memory_space<vmem>>, %arg3: memref<2x32xf32, #tpu.memory_space<vmem>>, %arg4: memref<2x32xf32, #tpu.memory_space<vmem>>, %arg5: memref<2x32xf32, #tpu.memory_space<vmem>>) attributes {dimension_semantics = [#tpu.dimension_semantics<arbitrary>], iteration_bounds = array<i64: 2>, scalar_prefetch = 0 : i64, scratch_operands = 1 : i64, tpu.core_type = #tpu.core_type<tc>, window_params = [{transform_indices = @transform_0, window_bounds = array<i64: 2, 32, 128>}, {pipeline_mode = #tpu.pipeline_mode<synchronous>, transform_indices = @transform_1, window_bounds = array<i64: 32, 2>}, {pipeline_mode = #tpu.pipeline_mode<synchronous>, transform_indices = @transform_2, window_bounds = array<i64: 2, 32>}, {pipeline_mode = #tpu.pipeline_mode<synchronous>, transform_indices = @transform_3, window_bounds = array<i64: 2, 32>}]} {
    %c0_i32 = arith.constant 0 : i32
    %0 = arith.cmpi eq, %arg0, %c0_i32 : i32
    %1 = arith.extui %0 : i1 to i32
    %c0_i32_0 = arith.constant 0 : i32
    %2 = arith.cmpi ne, %1, %c0_i32_0 : i32
    scf.if %2 {
      %cst_8 = arith.constant 0.000000e+00 : f32
      %11 = vector.broadcast %cst_8 : f32 to vector<2x32xf32>
      %c0_9 = arith.constant 0 : index
      %c0_10 = arith.constant 0 : index
      %12 = vector.load %arg5[%c0_9, %c0_10] : memref<2x32xf32, #tpu.memory_space<vmem>>, vector<2x32xf32>
      tpu.vector_store %arg5[%c0_9, %c0_10], %11 {strides = array<i32>} : memref<2x32xf32, #tpu.memory_space<vmem>>, vector<2x32xf32>,
    } else {
    }
    %c0 = arith.constant 0 : index
    %c0_1 = arith.constant 0 : index
    %3 = vector.load %arg5[%c0, %c0_1] : memref<2x32xf32, #tpu.memory_space<vmem>>, vector<2x32xf32>
    %c0_2 = arith.constant 0 : index
    %c0_3 = arith.constant 0 : index
    %c0_4 = arith.constant 0 : index
    %4 = vector.load %arg1[%c0_2, %c0_3, %c0_4] : memref<2x32x128xf32, #tpu.memory_space<vmem>>, vector<2x32x128xf32>
    %cst = arith.constant dense<0.000000e+00> : vector<2x32xf32>
    %5 = vector.multi_reduction <add>, %4, %cst [2] : vector<2x32x128xf32> to vector<2x32xf32>
    %6 = arith.addf %3, %5 : vector<2x32xf32>
    %c0_5 = arith.constant 0 : index
    %c0_6 = arith.constant 0 : index
    %7 = vector.load %arg5[%c0_5, %c0_6] : memref<2x32xf32, #tpu.memory_space<vmem>>, vector<2x32xf32>
    tpu.vector_store %arg5[%c0_5, %c0_6], %6 {strides = array<i32>} : memref<2x32xf32, #tpu.memory_space<vmem>>, vector<2x32xf32>,
    %c1_i32 = arith.constant 1 : i32
    %8 = arith.cmpi eq, %arg0, %c1_i32 : i32
    %9 = arith.extui %8 : i1 to i32
    %c0_i32_7 = arith.constant 0 : i32
    %10 = arith.cmpi ne, %9, %c0_i32_7 : i32
    scf.if %10 {
      %c0_8 = arith.constant 0 : index
      %c0_9 = arith.constant 0 : index
      %11 = vector.load %arg5[%c0_8, %c0_9] : memref<2x32xf32, #tpu.memory_space<vmem>>, vector<2x32xf32>
      %c0_10 = arith.constant 0 : index
      %c0_11 = arith.constant 0 : index
      %12 = vector.load %arg2[%c0_10, %c0_11] : memref<32x2xf32, #tpu.memory_space<vmem>>, vector<32x2xf32>
      %cst_12 = arith.constant dense<0.000000e+00> : vector<2x2xf32>
      %13 = tpu.matmul %11, %12, %cst_12 {dimension_numbers = #tpu.dot_dimension_numbers<[1], [0], [0], [1], [0, 0, 1, 1], [], []>} : vector<2x32xf32>, vector<32x2xf32>, vector<2x2xf32> -> vector<2x2xf32>
      %cst_13 = arith.constant 0.000000e+00 : f32
      %14 = vector.broadcast %cst_13 : f32 to vector<2x2xf32>
      %15 = arith.maximumf %13, %14 : vector<2x2xf32>
      %c0_14 = arith.constant 0 : index
      %c0_15 = arith.constant 0 : index
      %16 = vector.load %arg3[%c0_14, %c0_15] : memref<2x32xf32, #tpu.memory_space<vmem>>, vector<2x32xf32>
      %cst_16 = arith.constant dense<0.000000e+00> : vector<2x32xf32>
      %17 = tpu.matmul %15, %16, %cst_16 {dimension_numbers = #tpu.dot_dimension_numbers<[1], [0], [0], [1], [0, 0, 1, 1], [], []>} : vector<2x2xf32>, vector<2x32xf32>, vector<2x32xf32> -> vector<2x32xf32>
      %18 = arith.negf %17 : vector<2x32xf32>
      %19 = math.exp %18 : vector<2x32xf32>
      %cst_17 = arith.constant 1.000000e+00 : f32
      %20 = vector.broadcast %cst_17 : f32 to vector<2x32xf32>
      %21 = arith.addf %20, %19 : vector<2x32xf32>
      %22 = arith.divf %20, %21 : vector<2x32xf32>
      %c0_18 = arith.constant 0 : index
      %c0_19 = arith.constant 0 : index
      %23 = vector.load %arg4[%c0_18, %c0_19] : memref<2x32xf32, #tpu.memory_space<vmem>>, vector<2x32xf32>
      tpu.vector_store %arg4[%c0_18, %c0_19], %22 {strides = array<i32>} : memref<2x32xf32, #tpu.memory_space<vmem>>, vector<2x32xf32>,
    } else {
    }
    return
  }
  func.func @transform_0(%arg0: i32) -> (i32, i32, i32) {
    %c0_i32 = arith.constant 0 : i32
    %c0_i32_0 = arith.constant 0 : i32
    %c0_i32_1 = arith.constant 0 : i32
    return %c0_i32, %c0_i32_0, %arg0 : i32, i32, i32
  }
  func.func @transform_1(%arg0: i32) -> (i32, i32) {
    %c0_i32 = arith.constant 0 : i32
    %c0_i32_0 = arith.constant 0 : i32
    %c0_i32_1 = arith.constant 0 : i32
    return %c0_i32, %c0_i32_0 : i32, i32
  }
  func.func @transform_2(%arg0: i32) -> (i32, i32) {
    %c0_i32 = arith.constant 0 : i32
    %c0_i32_0 = arith.constant 0 : i32
    %c0_i32_1 = arith.constant 0 : i32
    return %c0_i32, %c0_i32_0 : i32, i32
  }
  func.func @transform_3(%arg0: i32) -> (i32, i32) {
    %c0_i32 = arith.constant 0 : i32
    %c0_i32_0 = arith.constant 0 : i32
    %c0_i32_1 = arith.constant 0 : i32
    return %c0_i32, %c0_i32_0 : i32, i32
  }
}

</mosaic_0001>

<bundles_post_ra>
// kernel: tpu_custom_call.1
= control target key start
LH: loop header
LB: loop body
LE: loop exit
PB: predicated region body
PF: predicated region fallthrough
CT: control target
= control target key end

     0   :  { %8 = vsyncpa [#allocation4], 0  ;;  %s865_s0 = inlined_call_operand.hbm [shape: f32[2,32,256], index: 0, kind: input, shape index: {}]   ;;  %s866_s1 = inlined_call_operand.vmem [shape: f32[32,2], index: 1, kind: input, shape index: {}]   ;;  %s867_s2 = inlined_call_operand.vmem [shape: f32[2,32], index: 2, kind: input, shape index: {}]   ;;  %s868_s3 = inlined_call_operand.hbm [shape: f32[2,32], index: 3, kind: output, shape index: {}]  }
   0x1   :  { %10 = vsyncpa [#allocation4 + $0x1], 0 }
   0x2   :  { %11 = vsyncpa [#allocation5], 0  ;;  %s722_s12 = smov 0   ;;  %s724_s13 = smov 0  }
   0x3   :  { %s726_s14 = smov 0   ;;  %s728_s15 = smov 0  }
   0x4 LB: > { %s741_s16 = sadd.s32 4294967295, %s691_s15   ;;  %s744_s17 = sadd.s32 1, %s691_s15   ;;  %s691_s15 = sphi %s728_s15, %s874_s15   ;;  %s687_s14 = sphi %s726_s14, %s873_s14   ;;  %s683_s13 = sphi %s724_s13, %s872_s13   ;;  %s679_s12 = sphi %s722_s12, %s871_s12  }
   0x5   : > { %s21_s18 = ssub.s32 %s691_s15, %s744_s17  ;;  %s24_s19 = sadd.s32 1, %s687_s14 }
   0x6   : > { %p22_p0 = scmp.eq.s32.totalorder %s21_s18, 0  ;;  %p31_p1 = scmp.ne.s32.totalorder %s687_s14, %s683_s13 }
   0x7   : > { %p32_p2 = scmp.eq.s32.totalorder %s691_s15, 0  ;;  %p37_p3 = scmp.ne.s32.totalorder %s683_s13, %s679_s12 }
   0x8   : > { %s754_s20 = scalar_select %p22_p0, %s687_s14, %s24_s19  }
   0x9   : > { %p33_p4 = por %p32_p2, %p31_p1  ;;  %p38_p5 = scmp.eq.s32.totalorder %s741_s16, 0 }
   0xa   : > { %p550_p6 = scmp.lt.s32.totalorder %s691_s15, 2  ;;  %s130_s22 = sand.u32 1, %s687_s14  }
   0xb   : > { %p758_p7 = por %p38_p5, %p37_p3  ;;  %s497_s23 = sshll.u32 %s130_s22, 6 }
   0xc   : > { %s498_s24 = sshll.u32 %s691_s15, 7  ;;  %s134_s28 = scalar_lea.vmem [#allocation3], %s497_s23 }
   0xd   : > { %s767_s27 = scalar_lea.hbm %s865_s0, %s498_s24  ;;  %s140_s29 = sshll.u32 %s134_s28, 4  ;;  %s769_s29 = int_to_ptr.vmem [resolvable:$true] %s140_s29 }
   0xe   : > { %p771_p8 = pnand %p550_p6, %p33_p4  ;;  %s775_s4 = scalar_lea.sflag [#allocation4], %s130_s22 }
   0xf   : > { %s597_s5 = scalar_lea.hbm %s767_s27, 1024  ;;  %s602_s8 = scalar_lea.hbm %s865_s0, 2048 }
  0x10   : > { %p598_p9 = scmp.ne.s32.totalorder %s767_s27, %s597_s5  ;;  %p599_p10 = pneg %p771_p8 }
  0x11   : > { %p603_p13 = scmp.lt.u32.totalorder %s767_s27, %s865_s0  ;;  %p604_p0 = scmp.lt.u32.totalorder %s602_s8, %s597_s5 }
  0x12   : > { %p600_p11 = pnand %p599_p10, %p598_p9  ;;  %p606_p2 = scmp.lt.u32.totalorder %s597_s5, %s767_s27 }
  0x13   : > { %p605_p1 = por %p604_p0, %p603_p13 }
  0x14   : > { %p601_p12 = pneg %p600_p11 }
  0x15   : > { %p607_p3 = por %p606_p2, %p605_p1 }
  0x17   : > { %p608_p4 = pnand %p607_p3, %p601_p12 }
  0x19   : > { %611 = shalt.err (!%p608_p4)
}
  0x1a   : > { %s612_s11 = scalar_lea.vmem %s769_s29, 1024  ;;  %s693_s12 = smov [#allocation3]  }
  0x1b   : > { %p613_p5 = scmp.ne.s32.totalorder %s769_s29, %s612_s11  ;;  %s617_s18 = sshll.u32 %s693_s12, 4  ;;  %s618_s18 = int_to_ptr.vmem [resolvable:$false] %s617_s18 }
  0x1c   : > { %s619_s19 = scalar_lea.vmem %s618_s18, 2048  ;;  %p620_p11 = scmp.lt.s32.totalorder %s769_s29, %s618_s18 }
  0x1d   : > { %p615_p6 = pnand %p613_p5, %p599_p10  ;;  %p621_p13 = scmp.lt.s32.totalorder %s619_s19, %s612_s11 }
  0x1f   : > { %p616_p9 = pneg %p615_p6  ;;  %p622_p0 = por %p621_p13, %p620_p11 }
  0x21   : > { %p623_p1 = pnand %p622_p0, %p616_p9 }
  0x23   : > { %626 = shalt.err (!%p623_p1)
}
  0x24   : > { %s694_s22 = smov 256   ;;  %s695_s23 = smov 128  }
  0x25   : > { %s696_s24 = smov 8   ;;  %p499_p10 = scmp.ge.s32.totalorder %s691_s15, 1 }
  0x26   : > { %549 = dma.hbm_to_vmem [thread:$0]  (!%p771_p8), %s767_s27, 1024, %s769_s29, %s775_s4, %s694_s22, %s695_s23, %s696_s24  }
  0x27   : > { %p148_p12 = scmp.lt.s32.totalorder %s691_s15, 3 }
  0x29   : > { %p149_p2 = pnand %p499_p10, %p148_p12 }
  0x2a   : > { %s154_s25 = sand.u32 (!%p149_p2), 1, %s683_s13  }
  0x2b   : > { %152 = sbr.rel (%p149_p2) target bundleno = 708 (0x2c4), region = 32  ;;  %s500_s26 = sshll.u32 (!%p149_p2), %s154_s25, 6 }
  0x2c   : > { %s155_s28 = scalar_lea.sflag (!%p149_p2), [#allocation4], %s154_s25  ;;  %s158_s5 = scalar_lea.vmem (!%p149_p2), [#allocation3], %s500_s26 }
  0x32   : > { %670 = dma.done.wait (%p758_p7), %s155_s28, 1024  }
  0x33   : > { %672 = vsyncadd (%p758_p7), %s155_s28, 4294966272  ;;  %p501_p3 = scmp.ne.s32.totalorder %s741_s16, 0 }
  0x34   : > { %vm180_vm0 = vcmask (!%p501_p3), 254976   ;;  %v697_v0 = vmov (!%p501_p3), 0.0  }
  0x35   : > { %179 = sbr.rel (%p501_p3) target bundleno = 60 (0x3c), region = 40  ;;  %181 = vst.msk [vmem:[#allocation2] sm:$0x3] (!%p501_p3), %vm180_vm0, %v697_v0 }
  0x3c PF: > { %v187_v1 = vld [vmem:[%s158_s5 + $0x20] sm:$0xff]  ;;  %v188_v3 = vld [vmem:[%s158_s5 + $0x28] sm:$0xff]  ;;  %v189_v5 = vld [vmem:[%s158_s5 + $0x30] sm:$0xff]  ;;  %v215_v9 = vlaneseq  ;;  %vm226_vm1 = vcmask 130112   ;;  %vm233_vm2 = vcmask 195712   ;;  %vm240_vm3 = vcmask 261312  }
  0x3d   : > { %v183_v2 = vld [vmem:[%s158_s5] sm:$0xff]  ;;  %199 = vadd.xlane.f32.xlu1 %v187_v1  ;;  %v184_v4 = vld [vmem:[%s158_s5 + $0x8] sm:$0xff]  ;;  %v185_v6 = vld [vmem:[%s158_s5 + $0x10] sm:$0xff]  ;;  %vm261_vm4 = vcmask 1041409   ;;  %vm265_vm5 = vcmask 254976   ;;  %p502_p7 = scmp.ne.s32.totalorder %s741_s16, 1 }
  0x3e   : > { %191 = vadd.xlane.f32.xlu0 %v183_v2  ;;  %v190_v7 = vld [vmem:[%s158_s5 + $0x38] sm:$0xff]  ;;  %v216_v10 = vand.u32 127, %v215_v9  ;;  %v218_v15 = vshrl.u32 %v215_v9, 7  ;;  %v273_v45 = vld [vmem:[%s866_s1 + $0x8] sm:$0xff] (!%p502_p7)  ;;  %v274_v46 = vld [vmem:[%s866_s1 + $0x10] sm:$0xff] (!%p502_p7)  ;;  %v698_v47 = vmov (!%p502_p7), 0.0|0.0  }
  0x3f   : > { %v186_v8 = vld [vmem:[%s158_s5 + $0x18] sm:$0xff]  ;;  %534 = vmatprep.subr.bf16.mxu0 (!%p502_p7), %v698_v47  ;;  %vm699_vm6 = vmmov (!%p502_p7), 0   ;;  %v700_v50 = vmov (!%p502_p7), 0.0   ;;  %vm276_vm7 = vcmask (!%p502_p7), 261120   ;;  %vm356_vm8 = vcmask (!%p502_p7), 1041408  }
  0x40   : > { %v221_v13 = vadd.s32 4294967288, %v216_v10  ;;  %v228_v14 = vadd.s32 4294967280, %v216_v10  ;;  %v235_v19 = vadd.s32 4294967272, %v216_v10  ;;  %v219_v21 = vsub.s32 %v216_v10, %v218_v15  ;;  %v182_v39 = vld [vmem:[#allocation2] sm:$0x3]  ;;  %v275_v49 = vld [vmem:[%s866_s1 + $0x18] sm:$0xff] (!%p502_p7)  ;;  %526 = vmatprep.mubr.msk.f32.mxu0 (!%p502_p7), %vm699_vm6, %v700_v50  ;;  %529 = vmatprep.subr.mxu1 (!%p502_p7), %v700_v50 }
  0x41   : > { %201 = vadd.xlane.f32.xlu1 %v188_v3  ;;  %v272_v44 = vld [vmem:[%s866_s1] sm:$0xff] (!%p502_p7)  ;;  %531 = vmatprep.mubr.msk.f32.mxu1 (!%p502_p7), %vm699_vm6, %v700_v50  ;;  %v538_v51 = vpack.c.bf16 (!%p502_p7), %v275_v49, %v274_v46  ;;  %vm352_vm9 = vcmask (!%p502_p7), 15360  }
  0x42   : > { %193 = vadd.xlane.f32.xlu0 %v184_v4  ;;  %v224_v18 = vsub.s32 %v221_v13, %v218_v15  ;;  %v231_v20 = vsub.s32 %v228_v14, %v218_v15  ;;  %v238_v26 = vsub.s32 %v235_v19, %v218_v15  ;;  %v535_v48 = vpack.c.bf16 (!%p502_p7), %v273_v45, %v272_v44  ;;  %v351_v53 = vld [vmem:[%s867_s2] sm:$0x3] (!%p502_p7) }
  0x43   : > { %530 = vmatpush3.msk.msra.mxu1 (!%p502_p7), %vm356_vm8, %v351_v53 }
  0x44   : > { %536 = vmatpush3.bf16.msra.mxu0 (!%p502_p7), %v535_v48 }
  0x45   : > { %203 = vadd.xlane.f32.xlu1 %v189_v5  ;;  %537 = vmatprep.subr.bf16.mxu0 (!%p502_p7), %v698_v47 }
  0x46   : > { %195 = vadd.xlane.f32.xlu0 %v185_v6 }
  0x48   : > { %539 = vmatpush3.bf16.msra.mxu0 (!%p502_p7), %v538_v51 }
  0x49   : > { %205 = vadd.xlane.f32.xlu1 %v190_v7 }
  0x4a   : > { %197 = vadd.xlane.f32.xlu0 %v186_v8 }
  0xca   : > { %v200_v11 = vpop.xlane.xlu1 %199 }
  0xcb   : > { %v192_v12 = vpop.xlane.xlu0 %191  ;;  %v245_v29 = vrot.slane %v200_v11, %v219_v21 }
  0xcc   : > { %v220_v30 = vrot.slane %v192_v12, %v219_v21 }
  0xce   : > { %v202_v16 = vpop.xlane.xlu1 %201 }
  0xcf   : > { %v194_v17 = vpop.xlane.xlu0 %193  ;;  %v249_v24 = vrot.slane %v202_v16, %v224_v18 }
  0xd0   : > { %v225_v25 = vrot.slane %v194_v17, %v224_v18 }
  0xd1   : > { %v250_v33 = vsel %vm226_vm1, %v249_v24, %v245_v29 }
  0xd2   : > { %v204_v22 = vpop.xlane.xlu1 %203  ;;  %v227_v34 = vsel %vm226_vm1, %v225_v25, %v220_v30 }
  0xd3   : > { %v196_v23 = vpop.xlane.xlu0 %195  ;;  %v254_v27 = vrot.slane %v204_v22, %v231_v20 }
  0xd4   : > { %v232_v28 = vrot.slane %v196_v23, %v231_v20 }
  0xd5   : > { %v255_v37 = vsel %vm233_vm2, %v254_v27, %v250_v33 }
  0xd6   : > { %v206_v31 = vpop.xlane.xlu1 %205  ;;  %v234_v38 = vsel %vm233_vm2, %v232_v28, %v227_v34 }
  0xd7   : > { %v198_v32 = vpop.xlane.xlu0 %197  ;;  %v259_v35 = vrot.slane %v206_v31, %v238_v26 }
  0xd8   : > { %v239_v36 = vrot.slane %v198_v32, %v238_v26  ;;  %270 = sbr.rel (%p502_p7) target bundleno = 683 (0x2ab), region = 44 }
  0xd9   : > { %v260_v40 = vsel %vm240_vm3, %v259_v35, %v255_v37 }
  0xda   : > { %v241_v41 = vsel %vm240_vm3, %v239_v36, %v234_v38 }
  0xdb   : > { %v262_v42 = vsel %vm261_vm4, %v260_v40, %v241_v41 }
  0xdc   : > { %v264_v43 = vadd.f32 %v262_v42, %v182_v39 }
  0xde   : > { %266 = vst.msk [vmem:[#allocation2] sm:$0x3] %vm265_vm5, %v264_v43 }
  0xe5   : > { %v271_v52 = vld [vmem:[#allocation2] sm:$0x3] }
  0xe6   : > { %527 = vmatmul.mubr.msk.f32.vlgmr.msra.gmra.mrb[0].mxu0 %vm276_vm7, %v271_v52 }
 0x1b9   : > { %v346_v54 = vpop.f32.mrb[0].mxu0 }
 0x1ba   : > { %v350_v55 = vmax.f32 %v346_v54, 0.0  ;;  %v528_v56 = vpop.f32.mrb[1].mxu0 }
 0x1bc   : > { %532 = vmatmul.mubr.msk.f32.vlgmr.msra.gmra.mrb[0].mxu1 %vm352_vm9, %v350_v55 }
 0x28f   : > { %v426_v57 = vpop.f32.mrb[0].mxu1 }
 0x290   : > { %v506_v58 = vmul.f32 -1.442695, %v426_v57  ;;  %v533_v59 = vpop.f32.mrb[1].mxu1 }
 0x292   : > { %593 = vpow2.f32 %v506_v58 }
 0x29c   : > { %v594_v60 = vpop.eup %593 }
 0x29d   : > { %v433_v61 = vadd.f32 1.0, %v594_v60 }
 0x29f   : > { %595 = vrcp.f32 %v433_v61 }
 0x2a9   : > { %v596_v62 = vpop.eup %595 }
 0x2aa   : > { %436 = vst.msk [vmem:[#allocation6] sm:$0x3] %vm265_vm5, %v596_v62 }
 0x2ab PF: > { %p551_p8 = scmp.eq.s32.totalorder %s741_s16, 1  ;;  %s701_s10 = smov [#allocation6]  }
 0x2ac   : > { %s444_s11 = sshll.u32 %s701_s10, 4  ;;  %s445_s11 = int_to_ptr.vmem [resolvable:$true] %s444_s11 }
 0x2ad   : > { %s627_s12 = scalar_lea.vmem %s445_s11, 32  ;;  %p634_p9 = scmp.lt.s32.totalorder %s445_s11, %s445_s11 }
 0x2ae   : > { %p628_p4 = scmp.ne.s32.totalorder %s445_s11, %s627_s12  ;;  %p635_p11 = scmp.lt.s32.totalorder %s627_s12, %s627_s12 }
 0x2b0   : > { %p629_p5 = pnand %p628_p4, %p551_p8  ;;  %p636_p13 = por %p635_p11, %p634_p9 }
 0x2b2   : > { %p630_p6 = pneg %p629_p5 }
 0x2b4   : > { %p637_p0 = pnand %p636_p13, %p630_p6 }
 0x2b6   : > { %640 = shalt.err (!%p637_p0)
}
 0x2b7   : > { %s641_s22 = scalar_lea.hbm %s868_s3, 32 }
 0x2b8   : > { %p642_p1 = scmp.ne.s32.totalorder %s868_s3, %s641_s22  ;;  %p647_p2 = scmp.lt.u32.totalorder %s641_s22, %s868_s3 }
 0x2ba   : > { %p643_p10 = pnand %p642_p1, %p551_p8 }
 0x2bc   : > { %p644_p12 = pneg %p643_p10 }
 0x2be   : > { %p649_p3 = pnand %p647_p2, %p644_p12 }
 0x2c0   : > { %652 = shalt.err (!%p649_p3)
}
 0x2c1   : > { %543 = dma.vmem_to_hbm [thread:$0]  (%p551_p8), %s445_s11, 32, %s868_s3, [#allocation5]  }
 0x2c2   : > { %674 = dma.done.wait (%p551_p8), [#allocation5], 32  }
 0x2c3   : > { %676 = vsyncadd (%p551_p8), [#allocation5], 4294967264 }
 0x2c4 PF: > { %p14_p7 = scmp.ge.s32.totalorder %s744_s17, 4   ;;  %s871_s12 = smov %s683_s13 }
 0x2c5   : > { %s872_s13 = smov %s687_s14  ;;  %s873_s14 = smov %s754_s20 }
 0x2c6   : > { %s874_s15 = smov %s744_s17  ;;  %16 = sbr.rel (!%p14_p7) target bundleno = 4 (0x4), region = 77 }
 0x2cd   :  { %457 = vsyncpa [#allocation4], 1 }
 0x2ce   :  { %459 = vsyncpa [#allocation4 + $0x1], 1 }
 0x2cf   :  { %460 = vsyncpa [#allocation5], 1 }
 0x2d0   :  { %462 = vsyncpa [#allocation5 + $0x1], 1 }

</bundles_post_ra>
